<compile_context>
chip_gen: v7x
topology: tpu7x:2x2x1
jax: 0.10.0
libtpu: 0.0.40
codegen_flags: <defaults>
</compile_context>

<pallas_src>
import functools

import numpy as np
import jax
import jax.numpy as jnp
from jax.experimental import pallas as pl
from jax.experimental.pallas import tpu as pltpu

KS = 3            # kernel_size
NEG_SLOPE = 1.0   # nn.LeakyReLU(True): bool taken as negative_slope -> 1.0 == identity
                  # TODO(synk): if the author meant inplace=True (slope 0.01), insert
                  # jnp.where(t1 >= 0, t1, 0.01 * t1) between conv1 and conv2.
SUB = 8           # f32 sublane count
LANE = 128

# Keep f32 at these tiny channel counts (exact parity with the f32 XLA reference;
# v5e has no bf16 VPU path).  Switch to jnp.bfloat16 on v6e/v7x for Cin >= 64.
MXU_DTYPE = jnp.float32


def _round_up(x, m):
    return (x + m - 1) // m * m


def residual_block_kernel(x_ref, aux_ref, w1_ref, w2_ref, wx_ref, o_ref, *, Wp, NL):
    # Tap offsets in the flattened padded frame, (dy, dx)-major order.
    offsets = [(dy - 1) * Wp + (dx - 1) for dy in range(KS) for dx in range(KS)]

    aux = aux_ref[...]          # (8, NL): row0 = ones (bias row), row1 = interior mask
    mask = aux[1:2, :]          # (1, NL)  -> 1 on real pixels, 0 on pad rows/cols/tail
    x = x_ref[0]                # (CIN_PAD, NL), exact zeros in pad lanes & pad channels

    def conv(t, w_ref):
        # Build im2col with lane rolls (XLU); every piece is an 8-row-aligned block,
        # roll wraparound only ever lands on masked (pad) lanes.
        taps = [t if d == 0 else pltpu.roll(t, (-d) % NL, axis=1) for d in offsets]
        patches = jnp.concatenate([aux] + taps, axis=0).astype(MXU_DTYPE)
        # Single MXU matmul per conv; bias folded via aux ones-row / weight column 0.
        return jnp.dot(w_ref[...].astype(MXU_DTYPE), patches,
                       preferred_element_type=jnp.float32)

    t1 = conv(x, w1_ref) * mask          # block[0]; LeakyReLU(slope=1.0) elided (identity)
    t2 = conv(t1, w2_ref) * mask         # block[2]
    o_ref[0] = conv(x + t2, wx_ref)      # conv_x; pad lanes are garbage, wrapper crops interior


def _pack_weights(w_hwio, b, cout_pad, cin_pad):
    """(3,3,Cin,Cout) HWIO + (Cout,) bias -> (cout_pad, 8 + 9*cin_pad).

    Column 0 carries the bias (paired with the aux ones-row), columns 1..7 are
    zero (paired with the mask / spare aux rows), then tap-major (dy,dx),
    channel-minor weights with Cin zero-padded to cin_pad.
    """
    KH, KW, cin, cout = w_hwio.shape
    wt = jnp.transpose(w_hwio, (3, 0, 1, 2))                              # (Cout, 3, 3, Cin)
    wt = jnp.pad(wt, ((0, cout_pad - cout), (0, 0), (0, 0), (0, cin_pad - cin)))
    wt = wt.reshape(cout_pad, KH * KW * cin_pad)
    bias_blk = jnp.zeros((cout_pad, SUB), jnp.float32).at[:cout, 0].set(b)
    return jnp.concatenate([bias_blk, wt], axis=1)


def residual_block_pallas(x_nchw, params, *, grid_splits=None):
    """x: (N, Cin, H, W) float32.  Returns (N, Cout, H, W) float32 (NCHW)."""
    N, Cin, H, W = x_nchw.shape
    Cout = params["w_x"].shape[-1]
    Hp, Wp = H + 2, W + 2
    L = Hp * Wp
    LP = _round_up(L, LANE)              # per-image frame, lane aligned -> unmasked stores
    CIN_PAD = _round_up(Cin, SUB)
    CMID_PAD = CIN_PAD                   # conv1/conv2 outputs feed the next conv's input
    COUT_PAD = _round_up(Cout, SUB)

    # Grid: default 2-way so v7x's two TensorCores both get work; on single-TC
    # v5e/v6e pass grid_splits=1 to fold the whole batch into one wide matmul.
    G = grid_splits if grid_splits is not None else min(2, N)
    assert N % G == 0, "batch must be divisible by grid_splits"
    NB = N // G
    NL = NB * LP

    # Zero-pad channels to the sublane count and the image by 1px per side, flatten
    # spatial to the lane axis, lane-pad to a multiple of 128, fold NB images per step.
    # TODO(synk): for large feature maps move this pad (and the final crop) in-kernel
    # (DMA the unpadded block + roll/mask) and tile H in row strips sized for v7x's
    # 64 MiB VMEM; both are negligible extra HBM passes at 2x4x16x16.
    x_pad = jnp.pad(x_nchw, ((0, 0), (0, CIN_PAD - Cin), (1, 1), (1, 1)))
    x_pad = x_pad.reshape(N, CIN_PAD, L)
    x_pad = jnp.pad(x_pad, ((0, 0), (0, 0), (0, LP - L)))
    x_fold = (x_pad.reshape(G, NB, CIN_PAD, LP)
                    .transpose(0, 2, 1, 3)
                    .reshape(G, CIN_PAD, NL))

    # aux constant input: row 0 = ones (bias row of the folded matmul),
    # row 1 = interior mask (1 on real pixels, 0 on pad rows/cols and lane tail),
    # rows 2..7 = 0.  Precomputed host-side; zero in-kernel work.
    m = np.zeros((Hp, Wp), np.float32)
    m[1:H + 1, 1:W + 1] = 1.0
    m = np.concatenate([m.reshape(-1), np.zeros(LP - L, np.float32)])
    aux = np.zeros((SUB, NL), np.float32)
    aux[0, :] = 1.0
    aux[1, :] = np.tile(m, NB)
    aux = jnp.asarray(aux)

    w1 = _pack_weights(params["w_b1"], params["b_b1"], CMID_PAD, CIN_PAD)
    w2 = _pack_weights(params["w_b2"], params["b_b2"], CMID_PAD, CIN_PAD)
    wx = _pack_weights(params["w_x"],  params["b_x"],  COUT_PAD, CIN_PAD)

    full = lambda a: pl.BlockSpec(a.shape, lambda g: (0, 0))

    out = pl.pallas_call(
        functools.partial(residual_block_kernel, Wp=Wp, NL=NL),
        out_shape=jax.ShapeDtypeStruct((G, COUT_PAD, NL), jnp.float32),
        grid_spec=pltpu.PrefetchScalarGridSpec(
            num_scalar_prefetch=0,
            grid=(G,),
            in_specs=[
                pl.BlockSpec((1, CIN_PAD, NL), lambda g: (g, 0, 0)),
                full(aux), full(w1), full(w2), full(wx),
            ],
            out_specs=pl.BlockSpec((1, COUT_PAD, NL), lambda g: (g, 0, 0)),
        ),
        compiler_params=pltpu.CompilerParams(
            dimension_semantics=("parallel",)),
    )(x_fold, aux, w1, w2, wx)

    # Unfold batch, drop channel / lane padding, crop the 1px zero border -> NCHW.
    out = (out.reshape(G, COUT_PAD, NB, LP)
              .transpose(0, 2, 1, 3)
              .reshape(N, COUT_PAD, LP)[:, :Cout, :L]
              .reshape(N, Cout, Hp, Wp)[:, :, 1:H + 1, 1:W + 1])
    return out


def residual_block_ref(x_nchw, params):
    """Pure-JAX reference (XLA conv) for correctness checking."""
    def conv(inp, w, b):
        y = jax.lax.conv_general_dilated(
            inp, w, window_strides=(1, 1), padding="SAME",
            dimension_numbers=("NCHW", "HWIO", "NCHW"))
        return y + b.reshape(1, -1, 1, 1)

    t1 = conv(x_nchw, params["w_b1"], params["b_b1"])
    t1 = jnp.where(t1 >= 0, t1, NEG_SLOPE * t1)   # identity (slope 1.0), kept for clarity
    t2 = conv(t1, params["w_b2"], params["b_b2"])
    return conv(x_nchw + t2, params["w_x"], params["b_x"])


def make_params(key, in_features=4, out_features=8):
    ks = jax.random.split(key, 6)

    def w(k, cin, cout):
        return (jax.random.normal(k, (KS, KS, cin, cout), jnp.float32)
                * (1.0 / (KS * KS * cin) ** 0.5))

    def b(k, cout):
        return jax.random.normal(k, (cout,), jnp.float32) * 0.01

    return {
        "w_b1": w(ks[0], in_features, in_features), "b_b1": b(ks[1], in_features),
        "w_b2": w(ks[2], in_features, in_features), "b_b2": b(ks[3], in_features),
        "w_x":  w(ks[4], in_features, out_features), "b_x": b(ks[5], out_features),
    }


if __name__ == "__main__":
    key = jax.random.PRNGKey(0)
    k_x, k_p = jax.random.split(key)

    N, Cin, Cout, H, W = 2, 4, 8, 16, 16
    x = jax.random.normal(k_x, (N, Cin, H, W), jnp.float32)
    params = make_params(k_p, in_features=Cin, out_features=Cout)

    out = jax.block_until_ready(residual_block_pallas(x, params))
    ref = jax.block_until_ready(residual_block_ref(x, params))

    assert out.shape == ref.shape == (N, Cout, H, W)
    err = float(jnp.max(jnp.abs(out - ref)))
    assert jnp.allclose(out, ref, atol=1e-3, rtol=1e-3), f"mismatch vs reference, max abs err {err}"

    print("KERNEL_OK")
</pallas_src>

<mosaic_0001>
module attributes {stable_mosaic.version = 11 : i64} {
  func.func @residual_block_kernel(%arg0: i32, %arg1: memref<1x8x384xf32, #tpu.memory_space<vmem>>, %arg2: memref<8x384xf32, #tpu.memory_space<vmem>>, %arg3: memref<8x80xf32, #tpu.memory_space<vmem>>, %arg4: memref<8x80xf32, #tpu.memory_space<vmem>>, %arg5: memref<8x80xf32, #tpu.memory_space<vmem>>, %arg6: memref<1x8x384xf32, #tpu.memory_space<vmem>>) attributes {dimension_semantics = [#tpu.dimension_semantics<parallel>], iteration_bounds = array<i64: 2>, scalar_prefetch = 0 : i64, scratch_operands = 0 : i64, tpu.core_type = #tpu.core_type<tc>, window_params = [{transform_indices = @transform_0, window_bounds = array<i64: 1, 8, 384>}, {pipeline_mode = #tpu.pipeline_mode<synchronous>, transform_indices = @transform_1, window_bounds = array<i64: 8, 384>}, {pipeline_mode = #tpu.pipeline_mode<synchronous>, transform_indices = @transform_2, window_bounds = array<i64: 8, 80>}, {pipeline_mode = #tpu.pipeline_mode<synchronous>, transform_indices = @transform_3, window_bounds = array<i64: 8, 80>}, {pipeline_mode = #tpu.pipeline_mode<synchronous>, transform_indices = @transform_4, window_bounds = array<i64: 8, 80>}, {transform_indices = @transform_5, window_bounds = array<i64: 1, 8, 384>}]} {
    %c0 = arith.constant 0 : index
    %c0_0 = arith.constant 0 : index
    %0 = vector.load %arg2[%c0, %c0_0] : memref<8x384xf32, #tpu.memory_space<vmem>>, vector<8x384xf32>
    %1 = vector.extract_strided_slice %0 {offsets = [1, 0], sizes = [1, 384], strides = [1, 1]} : vector<8x384xf32> to vector<1x384xf32>
    %c0_1 = arith.constant 0 : index
    %c0_2 = arith.constant 0 : index
    %c0_3 = arith.constant 0 : index
    %2 = vector.load %arg1[%c0_1, %c0_2, %c0_3] : memref<1x8x384xf32, #tpu.memory_space<vmem>>, vector<1x8x384xf32>
    %3 = vector.shape_cast %2 : vector<1x8x384xf32> to vector<8x384xf32>
    %c19_i32 = arith.constant 19 : i32
    %4 = tpu.dynamic_rotate %3 by %c19_i32 dim 1 : vector<8x384xf32>, i32 -> vector<8x384xf32>
    %c18_i32 = arith.constant 18 : i32
    %5 = tpu.dynamic_rotate %3 by %c18_i32 dim 1 : vector<8x384xf32>, i32 -> vector<8x384xf32>
    %c17_i32 = arith.constant 17 : i32
    %6 = tpu.dynamic_rotate %3 by %c17_i32 dim 1 : vector<8x384xf32>, i32 -> vector<8x384xf32>
    %c1_i32 = arith.constant 1 : i32
    %7 = tpu.dynamic_rotate %3 by %c1_i32 dim 1 : vector<8x384xf32>, i32 -> vector<8x384xf32>
    %c383_i32 = arith.constant 383 : i32
    %8 = tpu.dynamic_rotate %3 by %c383_i32 dim 1 : vector<8x384xf32>, i32 -> vector<8x384xf32>
    %c367_i32 = arith.constant 367 : i32
    %9 = tpu.dynamic_rotate %3 by %c367_i32 dim 1 : vector<8x384xf32>, i32 -> vector<8x384xf32>
    %c366_i32 = arith.constant 366 : i32
    %10 = tpu.dynamic_rotate %3 by %c366_i32 dim 1 : vector<8x384xf32>, i32 -> vector<8x384xf32>
    %c365_i32 = arith.constant 365 : i32
    %11 = tpu.dynamic_rotate %3 by %c365_i32 dim 1 : vector<8x384xf32>, i32 -> vector<8x384xf32>
    %12 = tpu.concatenate %0, %4, %5, %6, %7, %3, %8, %9, %10, %11 in 0 : vector<8x384xf32>, vector<8x384xf32>, vector<8x384xf32>, vector<8x384xf32>, vector<8x384xf32>, vector<8x384xf32>, vector<8x384xf32>, vector<8x384xf32>, vector<8x384xf32>, vector<8x384xf32> -> vector<80x384xf32>
    %c0_4 = arith.constant 0 : index
    %c0_5 = arith.constant 0 : index
    %13 = vector.load %arg3[%c0_4, %c0_5] : memref<8x80xf32, #tpu.memory_space<vmem>>, vector<8x80xf32>
    %cst = arith.constant dense<0.000000e+00> : vector<8x384xf32>
    %14 = tpu.matmul %13, %12, %cst {dimension_numbers = #tpu.dot_dimension_numbers<[1], [0], [0], [1], [0, 0, 1, 1], [], []>} : vector<8x80xf32>, vector<80x384xf32>, vector<8x384xf32> -> vector<8x384xf32>
    %15 = vector.broadcast %1 : vector<1x384xf32> to vector<8x384xf32>
    %16 = arith.mulf %14, %15 : vector<8x384xf32>
    %c19_i32_6 = arith.constant 19 : i32
    %17 = tpu.dynamic_rotate %16 by %c19_i32_6 dim 1 : vector<8x384xf32>, i32 -> vector<8x384xf32>
    %c18_i32_7 = arith.constant 18 : i32
    %18 = tpu.dynamic_rotate %16 by %c18_i32_7 dim 1 : vector<8x384xf32>, i32 -> vector<8x384xf32>
    %c17_i32_8 = arith.constant 17 : i32
    %19 = tpu.dynamic_rotate %16 by %c17_i32_8 dim 1 : vector<8x384xf32>, i32 -> vector<8x384xf32>
    %c1_i32_9 = arith.constant 1 : i32
    %20 = tpu.dynamic_rotate %16 by %c1_i32_9 dim 1 : vector<8x384xf32>, i32 -> vector<8x384xf32>
    %c383_i32_10 = arith.constant 383 : i32
    %21 = tpu.dynamic_rotate %16 by %c383_i32_10 dim 1 : vector<8x384xf32>, i32 -> vector<8x384xf32>
    %c367_i32_11 = arith.constant 367 : i32
    %22 = tpu.dynamic_rotate %16 by %c367_i32_11 dim 1 : vector<8x384xf32>, i32 -> vector<8x384xf32>
    %c366_i32_12 = arith.constant 366 : i32
    %23 = tpu.dynamic_rotate %16 by %c366_i32_12 dim 1 : vector<8x384xf32>, i32 -> vector<8x384xf32>
    %c365_i32_13 = arith.constant 365 : i32
    %24 = tpu.dynamic_rotate %16 by %c365_i32_13 dim 1 : vector<8x384xf32>, i32 -> vector<8x384xf32>
    %25 = tpu.concatenate %0, %17, %18, %19, %20, %16, %21, %22, %23, %24 in 0 : vector<8x384xf32>, vector<8x384xf32>, vector<8x384xf32>, vector<8x384xf32>, vector<8x384xf32>, vector<8x384xf32>, vector<8x384xf32>, vector<8x384xf32>, vector<8x384xf32>, vector<8x384xf32> -> vector<80x384xf32>
    %c0_14 = arith.constant 0 : index
    %c0_15 = arith.constant 0 : index
    %26 = vector.load %arg4[%c0_14, %c0_15] : memref<8x80xf32, #tpu.memory_space<vmem>>, vector<8x80xf32>
    %cst_16 = arith.constant dense<0.000000e+00> : vector<8x384xf32>
    %27 = tpu.matmul %26, %25, %cst_16 {dimension_numbers = #tpu.dot_dimension_numbers<[1], [0], [0], [1], [0, 0, 1, 1], [], []>} : vector<8x80xf32>, vector<80x384xf32>, vector<8x384xf32> -> vector<8x384xf32>
    %28 = vector.broadcast %1 : vector<1x384xf32> to vector<8x384xf32>
    %29 = arith.mulf %27, %28 : vector<8x384xf32>
    %30 = arith.addf %3, %29 : vector<8x384xf32>
    %c19_i32_17 = arith.constant 19 : i32
    %31 = tpu.dynamic_rotate %30 by %c19_i32_17 dim 1 : vector<8x384xf32>, i32 -> vector<8x384xf32>
    %c18_i32_18 = arith.constant 18 : i32
    %32 = tpu.dynamic_rotate %30 by %c18_i32_18 dim 1 : vector<8x384xf32>, i32 -> vector<8x384xf32>
    %c17_i32_19 = arith.constant 17 : i32
    %33 = tpu.dynamic_rotate %30 by %c17_i32_19 dim 1 : vector<8x384xf32>, i32 -> vector<8x384xf32>
    %c1_i32_20 = arith.constant 1 : i32
    %34 = tpu.dynamic_rotate %30 by %c1_i32_20 dim 1 : vector<8x384xf32>, i32 -> vector<8x384xf32>
    %c383_i32_21 = arith.constant 383 : i32
    %35 = tpu.dynamic_rotate %30 by %c383_i32_21 dim 1 : vector<8x384xf32>, i32 -> vector<8x384xf32>
    %c367_i32_22 = arith.constant 367 : i32
    %36 = tpu.dynamic_rotate %30 by %c367_i32_22 dim 1 : vector<8x384xf32>, i32 -> vector<8x384xf32>
    %c366_i32_23 = arith.constant 366 : i32
    %37 = tpu.dynamic_rotate %30 by %c366_i32_23 dim 1 : vector<8x384xf32>, i32 -> vector<8x384xf32>
    %c365_i32_24 = arith.constant 365 : i32
    %38 = tpu.dynamic_rotate %30 by %c365_i32_24 dim 1 : vector<8x384xf32>, i32 -> vector<8x384xf32>
    %39 = tpu.concatenate %0, %31, %32, %33, %34, %30, %35, %36, %37, %38 in 0 : vector<8x384xf32>, vector<8x384xf32>, vector<8x384xf32>, vector<8x384xf32>, vector<8x384xf32>, vector<8x384xf32>, vector<8x384xf32>, vector<8x384xf32>, vector<8x384xf32>, vector<8x384xf32> -> vector<80x384xf32>
    %c0_25 = arith.constant 0 : index
    %c0_26 = arith.constant 0 : index
    %40 = vector.load %arg5[%c0_25, %c0_26] : memref<8x80xf32, #tpu.memory_space<vmem>>, vector<8x80xf32>
    %cst_27 = arith.constant dense<0.000000e+00> : vector<8x384xf32>
    %41 = tpu.matmul %40, %39, %cst_27 {dimension_numbers = #tpu.dot_dimension_numbers<[1], [0], [0], [1], [0, 0, 1, 1], [], []>} : vector<8x80xf32>, vector<80x384xf32>, vector<8x384xf32> -> vector<8x384xf32>
    %c0_28 = arith.constant 0 : index
    %c0_29 = arith.constant 0 : index
    %c0_30 = arith.constant 0 : index
    %42 = vector.load %arg6[%c0_28, %c0_29, %c0_30] : memref<1x8x384xf32, #tpu.memory_space<vmem>>, vector<1x8x384xf32>
    %43 = vector.shape_cast %42 : vector<1x8x384xf32> to vector<8x384xf32>
    %44 = vector.shape_cast %41 : vector<8x384xf32> to vector<1x8x384xf32>
    tpu.vector_store %arg6[%c0_28, %c0_29, %c0_30], %44 {strides = array<i32>} : memref<1x8x384xf32, #tpu.memory_space<vmem>>, vector<1x8x384xf32>,
    return
  }
  func.func @transform_0(%arg0: i32) -> (i32, i32, i32) {
    %c0_i32 = arith.constant 0 : i32
    %c0_i32_0 = arith.constant 0 : i32
    %c0_i32_1 = arith.constant 0 : i32
    return %arg0, %c0_i32, %c0_i32_0 : i32, i32, i32
  }
  func.func @transform_1(%arg0: i32) -> (i32, i32) {
    %c0_i32 = arith.constant 0 : i32
    %c0_i32_0 = arith.constant 0 : i32
    %c0_i32_1 = arith.constant 0 : i32
    return %c0_i32, %c0_i32_0 : i32, i32
  }
  func.func @transform_2(%arg0: i32) -> (i32, i32) {
    %c0_i32 = arith.constant 0 : i32
    %c0_i32_0 = arith.constant 0 : i32
    %c0_i32_1 = arith.constant 0 : i32
    return %c0_i32, %c0_i32_0 : i32, i32
  }
  func.func @transform_3(%arg0: i32) -> (i32, i32) {
    %c0_i32 = arith.constant 0 : i32
    %c0_i32_0 = arith.constant 0 : i32
    %c0_i32_1 = arith.constant 0 : i32
    return %c0_i32, %c0_i32_0 : i32, i32
  }
  func.func @transform_4(%arg0: i32) -> (i32, i32) {
    %c0_i32 = arith.constant 0 : i32
    %c0_i32_0 = arith.constant 0 : i32
    %c0_i32_1 = arith.constant 0 : i32
    return %c0_i32, %c0_i32_0 : i32, i32
  }
  func.func @transform_5(%arg0: i32) -> (i32, i32, i32) {
    %c0_i32 = arith.constant 0 : i32
    %c0_i32_0 = arith.constant 0 : i32
    %c0_i32_1 = arith.constant 0 : i32
    return %arg0, %c0_i32, %c0_i32_0 : i32, i32, i32
  }
}

</mosaic_0001>

<bundles_post_ra>
// kernel: tpu_custom_call.1
= control target key start
LH: loop header
LB: loop body
LE: loop exit
PB: predicated region body
PF: predicated region fallthrough
CT: control target
= control target key end

     0   :  { %10 = vsyncpa [#allocation3], 0  ;;  %s2348_s0 = inlined_call_operand.hbm [shape: f32[2,8,384], index: 0, kind: input, shape index: {}]   ;;  %s2349_s1 = inlined_call_operand.hbm [shape: f32[8,384], index: 1, kind: input, shape index: {}]   ;;  %s2350_s2 = inlined_call_operand.hbm [shape: f32[8,80], index: 2, kind: input, shape index: {}]   ;;  %s2351_s3 = inlined_call_operand.vmem [shape: f32[8,80], index: 3, kind: input, shape index: {}]   ;;  %s2352_s4 = inlined_call_operand.hbm [shape: f32[8,80], index: 4, kind: input, shape index: {}]   ;;  %s2353_s5 = inlined_call_operand.hbm [shape: f32[2,8,384], index: 5, kind: output, shape index: {}]  }
   0x1   :  { %12 = vsyncpa [#allocation3 + $0x1], 0 }
   0x2   :  { %13 = vsyncpa [#allocation6], 0 }
   0x3   :  { %14 = vsyncpa [#allocation9], 0 }
   0x4   :  { %15 = vsyncpa [#allocation4], 0 }
   0x5   :  { %17 = vsyncpa [#allocation4 + $0x1], 0  ;;  %s1760_s18 = smov 0   ;;  %s1762_s19 = smov 0  }
   0x6   :  { %s1764_s20 = smov 0   ;;  %s1766_s21 = smov 0  }
   0x7 LB: > { %s1781_s22 = sadd.s32 4294967295, %s1712_s21   ;;  %s1085_s23 = sadd.s32 4294967294, %s1712_s21   ;;  %s1712_s21 = sphi %s1766_s21, %s2376_s21   ;;  %s1708_s20 = sphi %s1764_s20, %s2375_s20   ;;  %s1704_s19 = sphi %s1762_s19, %s2374_s19   ;;  %s1700_s18 = sphi %s1760_s18, %s2373_s18  }
   0x8   : > { %p43_p0 = scmp.ne.s32.totalorder %s1704_s19, %s1700_s18  ;;  %p2354_p1 = scmp.eq.s32.totalorder %s1781_s22, 0 }
   0x9   : > { %p157_p3 = scmp.eq.s32.totalorder %s1085_s23, 1  ;;  %p1086_p5 = scmp.ge.s32.totalorder %s1712_s21, 1 }
   0xa   : > { %p1790_p4 = por %p2354_p1, %p43_p0  ;;  %p164_p7 = scmp.lt.s32.totalorder %s1712_s21, 3 }
   0xb   : > { %p1795_p6 = por %p157_p3, %p43_p0  ;;  %s1714_s27 = smov [#allocation5]  }
   0xc   : > { %s2357_s24 = scalar_select %p1790_p4, 1, 0 }
   0xd   : > { %s2358_s25 = scalar_select %p1795_p6, 1, 0 }
   0xe   : > { %p1800_p8 = pnand %p1086_p5, %p164_p7  ;;  %s177_s28 = sshll.u32 %s1714_s27, 4  ;;  %s178_s28 = int_to_ptr.vmem [resolvable:$true] %s177_s28 }
   0xf   : > { %s1715_s29 = smov [#allocation7]   ;;  %s1716_s7 = smov [#allocation8]  }
  0x10   : > { %s2359_s26 = scalar_select %p1800_p8, 1, 0 }
  0x11   : > { %p1332_p10 = pneg %p1800_p8  ;;  %s188_s30 = sshll.u32 %s1715_s29, 4  ;;  %s1813_s30 = int_to_ptr.vmem [resolvable:$true] %s188_s30 }
  0x12   : > { %s202_s8 = sshll.u32 %s1716_s7, 4  ;;  %s1524_s11 = scalar_lea.hbm %s2349_s1, 384  ;;  %s1815_s8 = int_to_ptr.vmem [resolvable:$true] %s202_s8 }
  0x13   : > { %p1809_p11 = pnand %p1332_p10, %p2354_p1  ;;  %p1525_p12 = scmp.ne.s32.totalorder %s2349_s1, %s1524_s11 }
  0x14   : > { %p1531_p5 = scmp.lt.u32.totalorder %s1524_s11, %s2349_s1 }
  0x15   : > { %p1825_p13 = pneg %p1809_p11 }
  0x17   : > { %p1527_p0 = pnand %p1825_p13, %p1525_p12 }
  0x19   : > { %p1528_p3 = pneg %p1527_p0 }
  0x1b   : > { %p1533_p7 = pnand %p1531_p5, %p1528_p3 }
  0x1d   : > { %1536 = shalt.err (!%p1533_p7)
}
  0x1e   : > { %s1537_s17 = scalar_lea.vmem %s178_s28, 384  ;;  %p1545_p2 = scmp.lt.s32.totalorder %s178_s28, %s178_s28 }
  0x1f   : > { %p1538_p10 = scmp.ne.s32.totalorder %s178_s28, %s1537_s17  ;;  %p1546_p6 = scmp.lt.s32.totalorder %s1537_s17, %s1537_s17 }
  0x21   : > { %p1540_p9 = pnand %p1538_p10, %p1825_p13  ;;  %p1547_p4 = por %p1546_p6, %p1545_p2 }
  0x23   : > { %p1541_p1 = pneg %p1540_p9 }
  0x25   : > { %p1548_p8 = pnand %p1547_p4, %p1541_p1 }
  0x27   : > { %1551 = shalt.err (!%p1548_p8)
}
  0x28   : > { %1335 = dma.hbm_to_vmem [thread:$0]  (!%p1809_p11), %s2349_s1, 384, %s178_s28, [#allocation6]  }
  0x29   : > { %s1552_s9 = scalar_lea.hbm %s2350_s2, 128 }
  0x2a   : > { %p1553_p9 = scmp.ne.s32.totalorder %s2350_s2, %s1552_s9  ;;  %p1559_p1 = scmp.lt.u32.totalorder %s1552_s9, %s2350_s2 }
  0x2c   : > { %p1555_p12 = pnand %p1553_p9, %p1825_p13 }
  0x2e   : > { %p1556_p2 = pneg %p1555_p12 }
  0x30   : > { %p1561_p4 = pnand %p1559_p1, %p1556_p2 }
  0x32   : > { %1564 = shalt.err (!%p1561_p4)
}
  0x33   : > { %s1565_s28 = scalar_lea.vmem %s1813_s30, 128  ;;  %p1573_p3 = scmp.lt.s32.totalorder %s1813_s30, %s1813_s30 }
  0x34   : > { %p1566_p6 = scmp.ne.s32.totalorder %s1813_s30, %s1565_s28  ;;  %p1574_p5 = scmp.lt.s32.totalorder %s1565_s28, %s1565_s28 }
  0x36   : > { %p1568_p8 = pnand %p1566_p6, %p1825_p13  ;;  %p1575_p7 = por %p1574_p5, %p1573_p3 }
  0x38   : > { %p1569_p0 = pneg %p1568_p8 }
  0x3a   : > { %p1576_p10 = pnand %p1575_p7, %p1569_p0 }
  0x3c   : > { %1579 = shalt.err (!%p1576_p10)
}
  0x3d   : > { %1338 = dma.hbm_to_vmem [thread:$0]  (!%p1809_p11), %s2350_s2, 128, %s1813_s30, [#allocation6]  }
  0x3e   : > { %s1580_s27 = scalar_lea.hbm %s2352_s4, 128 }
  0x3f   : > { %p1581_p9 = scmp.ne.s32.totalorder %s2352_s4, %s1580_s27  ;;  %p1587_p1 = scmp.lt.u32.totalorder %s1580_s27, %s2352_s4 }
  0x41   : > { %p1583_p12 = pnand %p1581_p9, %p1825_p13 }
  0x43   : > { %p1584_p2 = pneg %p1583_p12 }
  0x45   : > { %p1589_p4 = pnand %p1587_p1, %p1584_p2 }
  0x47   : > { %1592 = shalt.err (!%p1589_p4)
}
  0x48   : > { %s1593_s30 = scalar_lea.vmem %s1815_s8, 128  ;;  %p1601_p3 = scmp.lt.s32.totalorder %s1815_s8, %s1815_s8 }
  0x49   : > { %p1594_p6 = scmp.ne.s32.totalorder %s1815_s8, %s1593_s30  ;;  %p1602_p5 = scmp.lt.s32.totalorder %s1593_s30, %s1593_s30 }
  0x4b   : > { %p1596_p8 = pnand %p1594_p6, %p1825_p13  ;;  %p1603_p7 = por %p1602_p5, %p1601_p3 }
  0x4d   : > { %p1597_p0 = pneg %p1596_p8 }
  0x4f   : > { %p1604_p10 = pnand %p1603_p7, %p1597_p0 }
  0x51   : > { %1607 = shalt.err (!%p1604_p10)
}
  0x52   : > { %1341 = dma.hbm_to_vmem [thread:$0]  (!%p1809_p11), %s2352_s4, 128, %s1815_s8, [#allocation9]  }
  0x53   : > { %s1888_s14 = sadd.s32 1, %s1712_s21   ;;  %s30_s13 = sadd.s32 1, %s1708_s20 }
  0x54   : > { %s27_s6 = ssub.s32 %s1712_s21, %s1888_s14  ;;  %p37_p9 = scmp.ne.s32.totalorder %s1708_s20, %s1704_s19 }
  0x55   : > { %p28_p13 = scmp.eq.s32.totalorder %s27_s6, 0  ;;  %p38_p12 = scmp.eq.s32.totalorder %s1712_s21, 0 }
  0x56   : > { %p1353_p2 = scmp.lt.s32.totalorder %s1712_s21, 2  ;;  %p2362_p4 = scmp.eq.s32.totalorder %s1781_s22, 1 }
  0x57   : > { %s1898_s28 = scalar_select %p28_p13, %s1708_s20, %s30_s13  }
  0x58   : > { %p39_p1 = por %p38_p12, %p37_p9  ;;  %p1902_p6 = por %p2362_p4, %p37_p9 }
  0x59   : > { %s213_s16 = sand.u32 1, %s1708_s20   ;;  %s1313_s17 = smul.u32 384, %s1712_s21 }
  0x5a   : > { %s1312_s8 = smul.u32 24, %s213_s16  ;;  %p1908_p11 = pnand %p1353_p2, %p39_p1 }
  0x5b   : > { %s1915_s7 = scalar_lea.hbm %s2348_s0, %s1313_s17  ;;  %s214_s30 = scalar_lea.sflag [#allocation3], %s213_s16 }
  0x5c   : > { %s217_s9 = scalar_lea.vmem [#allocation2], %s1312_s8  ;;  %s1608_s11 = scalar_lea.hbm %s1915_s7, 384 }
  0x5d   : > { %s225_s10 = sshll.u32 %s217_s9, 4  ;;  %p1609_p8 = scmp.ne.s32.totalorder %s1915_s7, %s1608_s11  ;;  %s1917_s10 = int_to_ptr.vmem [resolvable:$true] %s225_s10 }
  0x5e   : > { %p1610_p0 = pneg %p1908_p11  ;;  %s1613_s13 = scalar_lea.hbm %s2348_s0, 768 }
  0x5f   : > { %p1614_p7 = scmp.lt.u32.totalorder %s1915_s7, %s2348_s0  ;;  %p1615_p10 = scmp.lt.u32.totalorder %s1613_s13, %s1608_s11 }
  0x60   : > { %p1611_p3 = pnand %p1610_p0, %p1609_p8  ;;  %p1617_p9 = scmp.lt.u32.totalorder %s1608_s11, %s1915_s7 }
  0x61   : > { %p1616_p13 = por %p1615_p10, %p1614_p7 }
  0x62   : > { %p1612_p5 = pneg %p1611_p3 }
  0x63   : > { %p1618_p12 = por %p1617_p9, %p1616_p13 }
  0x65   : > { %p1619_p2 = pnand %p1618_p12, %p1612_p5 }
  0x67   : > { %1622 = shalt.err (!%p1619_p2)
}
  0x68   : > { %s1623_s16 = scalar_lea.vmem %s1917_s10, 384  ;;  %s1717_s8 = smov [#allocation2]  }
  0x69   : > { %p1624_p1 = scmp.ne.s32.totalorder %s1917_s10, %s1623_s16  ;;  %s1628_s29 = sshll.u32 %s1717_s8, 4  ;;  %s1629_s29 = int_to_ptr.vmem [resolvable:$false] %s1628_s29 }
  0x6a   : > { %s1630_s9 = scalar_lea.vmem %s1629_s29, 768  ;;  %p1631_p3 = scmp.lt.s32.totalorder %s1917_s10, %s1629_s29 }
  0x6b   : > { %p1626_p4 = pnand %p1624_p1, %p1610_p0  ;;  %p1632_p7 = scmp.lt.s32.totalorder %s1630_s9, %s1623_s16 }
  0x6d   : > { %p1627_p8 = pneg %p1626_p4  ;;  %p1633_p10 = por %p1632_p7, %p1631_p3 }
  0x6f   : > { %p1634_p13 = pnand %p1633_p10, %p1627_p8 }
  0x71   : > { %1637 = shalt.err (!%p1634_p13)
}
  0x72   : > { %1345 = dma.hbm_to_vmem [thread:$0]  (!%p1908_p11), %s1915_s7, 384, %s1917_s10, %s214_s30  }
  0x73   : > { %p2365_p5 = scmp.ne.s32.totalorder %s2359_s26, 0 }
  0x74   : > { %s1947_s11 = sand.u32 (!%p2365_p5), 1, %s1704_s19   ;;  %p2366_p0 = scmp.ne.s32.totalorder (!%p2365_p5), %s2357_s24, 0 }
  0x75   : > { %234 = sbr.rel (%p2365_p5) target bundleno = 1240 (0x4d8), region = 40  ;;  %s237_s6 = scalar_lea.sflag (!%p2365_p5), [#allocation3], %s1947_s11 }
  0x76   : > { %s1314_s12 = smul.u32 (!%p2365_p5), 24, %s1947_s11 }
  0x78   : > { %s240_s13 = scalar_lea.vmem (!%p2365_p5), [#allocation2], %s1314_s12 }
  0x7c   : > { %1683 = dma.done.wait (%p2366_p0), %s237_s6, 384  }
  0x7d   : > { %1685 = vsyncadd (%p2366_p0), %s237_s6, 4294966912  ;;  %p2367_p11 = scmp.eq.s32.totalorder %s1781_s22, 0 }
  0x7f   : > { %1687 = dma.done.wait (%p2367_p11), [#allocation6], 512   ;;  %p2368_p9 = pmov %p2367_p11 }
  0x81   : > { %1689 = vsyncadd (%p2368_p9), [#allocation6], 4294966784  ;;  %p2369_p12 = pmov %p2368_p9 }
  0x82   : > { %p2370_p2 = pmov %p2368_p9 }
  0x83   : > { %1691 = dma.done.wait (%p2369_p12), [#allocation9], 128  }
  0x84   : > { %1693 = vsyncadd (%p2370_p2), [#allocation9], 4294967168  ;;  %v1718_v0 = vmov 0.0|0.0   ;;  %v1966_v1 = vld [vmem:[%s240_s13] sm:$0xff]  ;;  %v1968_v2 = vld [vmem:[%s240_s13 + $0x8] sm:$0xff]  ;;  %s1719_s24 = smov 18   ;;  %v291_v7 = vlaneseq }
  0x85   : > { %1227 = vmatprep.subr.bf16.mxu1 %v1718_v0  ;;  %v1409_v3 = vpack.i.bf16 %v1968_v2, %v1966_v1  ;;  %s1720_s26 = smov 19   ;;  %v1974_v4 = vld [vmem:[%s240_s13 + $0x10] sm:$0xff]  ;;  %s1721_s23 = smov 17   ;;  %v1725_v6 = vmov 0.0   ;;  %vm1726_vm0 = vmmov 0   ;;  %v2007_v13 = vld [vmem:[#allocation5 + $0x8] sm:$0xff] }
  0x86   : > { %s1722_s7 = smov 1   ;;  %v1429_v5 = vpack.i.bf16 %v1974_v4, %v1968_v2  ;;  %s1723_s10 = smov 111   ;;  %436 = vmatprep.mubr.f32.mxu0 %v1725_v6  ;;  %1158 = vmatprep.mubr.msk.f32.mxu1 %vm1726_vm0, %v1725_v6  ;;  %v2004_v8 = vand.u32 127, %v291_v7  ;;  %v2011_v17 = vld [vmem:[#allocation5] sm:$0xff]  ;;  %v2013_v18 = vld [vmem:[#allocation5 + $0x10] sm:$0xff]  ;;  %vm368_vm9 = vcmask 654336  }
  0x87   : > { %1410 = vrot.lane.b32.xlu1 %v1409_v3, %s1719_s24  ;;  %1405 = vrot.lane.b32.xlu0 %v1409_v3, %s1720_s26  ;;  %s1724_s30 = smov 127   ;;  %s1727_s17 = smov 109  }
  0x88   : > { %s1728_s27 = smov 110   ;;  %vm293_vm1 = vcmp.lt.s32.totalorder %v2004_v8, 19  ;;  %vm313_vm2 = vcmp.lt.s32.totalorder %v2004_v8, 17  ;;  %vm303_vm3 = vcmp.lt.s32.totalorder %v2004_v8, 18  ;;  %vm323_vm4 = vcmp.lt.s32.totalorder %v2004_v8, 1  ;;  %s278_s29 = scalar_lea.vmem [#allocation10], %s1314_s12 }
  0x89   : > { %vm343_vm5 = vcmp.lt.s32.totalorder %v2004_v8, 111  ;;  %vm333_vm6 = vcmp.lt.s32.totalorder %v2004_v8, 127  ;;  %vm363_vm7 = vcmp.lt.s32.totalorder %v2004_v8, 109  ;;  %vm353_vm8 = vcmp.lt.s32.totalorder %v2004_v8, 110  ;;  %s986_s9 = sshll.u32 %s278_s29, 4  ;;  %s1315_s6 = smul.u32 384, %s1781_s22  ;;  %s2301_s9 = int_to_ptr.vmem [resolvable:$true] %s986_s9 }
  0x8a   : > { %s972_s12 = scalar_lea.sflag [#allocation4], %s1947_s11  ;;  %s1729_s22 = smov [#allocation10]  }
  0x8b   : > { %1415 = vrot.lane.b32.xlu1 %v1409_v3, %s1721_s23  ;;  %289 = vrot.lane.b32.xlu0 %v1974_v4, %s1720_s26 }
  0x8f   : > { %311 = vrot.lane.b32.xlu1 %v1974_v4, %s1721_s23  ;;  %301 = vrot.lane.b32.xlu0 %v1974_v4, %s1719_s24 }
  0x93   : > { %321 = vrot.lane.b32.xlu1 %v1974_v4, %s1722_s7  ;;  %1420 = vrot.lane.b32.xlu0 %v1409_v3, %s1722_s7 }
  0x97   : > { %1430 = vrot.lane.b32.xlu1 %v1429_v5, %s1723_s10  ;;  %1425 = vrot.lane.b32.xlu0 %v1429_v5, %s1724_s30 }
  0x9b   : > { %337 = vrot.lane.b32.xlu1 %v1966_v1, %s1723_s10  ;;  %327 = vrot.lane.b32.xlu0 %v1966_v1, %s1724_s30 }
  0x9f   : > { %1440 = vrot.lane.b32.xlu1 %v1429_v5, %s1727_s17  ;;  %1435 = vrot.lane.b32.xlu0 %v1429_v5, %s1728_s27 }
  0xa3   : > { %357 = vrot.lane.b32.xlu1 %v1966_v1, %s1727_s17  ;;  %347 = vrot.lane.b32.xlu0 %v1966_v1, %s1728_s27 }
  0xf9   : > { %v1411_v9 = vpop.permute.xlu1 %1410  ;;  %v1406_v10 = vpop.permute.xlu0 %1405 }
  0xfa   : > { %v1408_v11 = vunpack.i.h.bf16 %v1406_v10  ;;  %v1407_v12 = vunpack.i.l.bf16 %v1406_v10  ;;  %v1413_v14 = vunpack.i.h.bf16 %v1411_v9  ;;  %v1412_v15 = vunpack.i.l.bf16 %v1411_v9 }
  0xfc   : > { %v295_v16 = vsel %vm293_vm1, %v1407_v12, %v1408_v11  ;;  %v305_v28 = vsel %vm303_vm3, %v1412_v15, %v1413_v14 }
  0xfd   : > { %v1416_v19 = vpop.permute.xlu1 %1415  ;;  %v290_v20 = vpop.permute.xlu0 %289  ;;  %v1207_v21 = vpack.c.bf16 %v295_v16, %v2007_v13 }
  0xfe   : > { %v1418_v22 = vunpack.i.h.bf16 %v1416_v19  ;;  %v1417_v23 = vunpack.i.l.bf16 %v1416_v19  ;;  %v294_v24 = vsel %vm293_vm1, %v1408_v11, %v290_v20  ;;  %v296_v25 = vsel %vm293_vm1, %v290_v20, %v1407_v12 }
  0xff   : > { %1208 = vmatprep.subr.bf16.mxu0 %v1207_v21  ;;  %v1209_v26 = vpack.c.bf16 %v296_v25, %v2011_v17  ;;  %v1228_v27 = vpack.c.bf16 %v294_v24, %v2013_v18 }
 0x100   : > { %v315_v29 = vsel %vm313_vm2, %v1417_v23, %v1418_v22 }
 0x101   : > { %v312_v30 = vpop.permute.xlu1 %311  ;;  %v302_v31 = vpop.permute.xlu0 %301  ;;  %1210 = vmatpush1.bf16.msra.mxu0 %v1209_v26  ;;  %1229 = vmatpush3.bf16.msra.mxu1 %v1228_v27  ;;  %v1211_v32 = vpack.c.bf16 %v315_v29, %v305_v28  ;;  %v367_v29 = vld [vmem:[#allocation7] sm:$0xff] }
 0x102   : > { %v314_v33 = vsel %vm313_vm2, %v1418_v22, %v312_v30  ;;  %v316_v34 = vsel %vm313_vm2, %v312_v30, %v1417_v23  ;;  %v304_v35 = vsel %vm303_vm3, %v1413_v14, %v302_v31  ;;  %v306_v36 = vsel %vm303_vm3, %v302_v31, %v1412_v15  ;;  %1230 = vmatprep.subr.bf16.mxu1 %v1718_v0 }
 0x103   : > { %v1213_v37 = vpack.c.bf16 %v316_v34, %v306_v36  ;;  %v1231_v38 = vpack.c.bf16 %v314_v33, %v304_v35  ;;  %1212 = vmatprep.subr.bf16.mxu0 %v1211_v32  ;;  %v514_v30 = vshrl.u32 %v291_v7, 7 }
 0x105   : > { %v322_v39 = vpop.permute.xlu1 %321  ;;  %v1421_v40 = vpop.permute.xlu0 %1420  ;;  %1214 = vmatpush1.bf16.msra.mxu0 %v1213_v37  ;;  %1232 = vmatpush3.bf16.msra.mxu1 %v1231_v38  ;;  %v515_v31 = vsub.s32 1, %v514_v30 }
 0x106   : > { %v1423_v41 = vunpack.i.h.bf16 %v1421_v40  ;;  %v1422_v42 = vunpack.i.l.bf16 %v1421_v40  ;;  %1233 = vmatprep.subr.bf16.mxu1 %v1718_v0 }
 0x107   : > { %v2086_v32 = vrot.slane %v2013_v18, %v515_v31  ;;  %v2089_v33 = vrot.slane %v2011_v17, %v515_v31  ;;  %v2098_v40 = vrot.slane %v2007_v13, %v515_v31 }
 0x108   : > { %v325_v43 = vsel %vm323_vm4, %v1422_v42, %v1423_v41  ;;  %v324_v44 = vsel %vm323_vm4, %v1423_v41, %v322_v39  ;;  %v326_v45 = vsel %vm323_vm4, %v322_v39, %v1422_v42 }
 0x109   : > { %v1431_v46 = vpop.permute.xlu1 %1430  ;;  %v1426_v47 = vpop.permute.xlu0 %1425  ;;  %v1215_v48 = vpack.c.bf16 %v1968_v2, %v325_v43  ;;  %v1234_v49 = vpack.c.bf16 %v1974_v4, %v324_v44  ;;  %v1217_v50 = vpack.c.bf16 %v1966_v1, %v326_v45 }
 0x10a   : > { %v1433_v51 = vunpack.i.h.bf16 %v1431_v46  ;;  %v1432_v52 = vunpack.i.l.bf16 %v1431_v46  ;;  %v1428_v53 = vunpack.i.h.bf16 %v1426_v47  ;;  %v1427_v54 = vunpack.i.l.bf16 %v1426_v47 }
 0x10b   : > { %1216 = vmatprep.subr.bf16.mxu0 %v1215_v48  ;;  %1235 = vmatpush3.bf16.msra.mxu1 %v1234_v49 }
 0x10c   : > { %1218 = vmatpush1.bf16.msra.mxu0 %v1217_v50  ;;  %v334_v55 = vsel %vm333_vm6, %v1427_v54, %v1428_v53  ;;  %v344_v56 = vsel %vm343_vm5, %v1432_v52, %v1433_v51  ;;  %1236 = vmatprep.subr.bf16.mxu1 %v1718_v0 }
 0x10d   : > { %v338_v57 = vpop.permute.xlu1 %337  ;;  %v328_v58 = vpop.permute.xlu0 %327  ;;  %v1219_v59 = vpack.c.bf16 %v344_v56, %v334_v55 }
 0x10e   : > { %v345_v60 = vsel %vm343_vm5, %v338_v57, %v1432_v52  ;;  %v346_v61 = vsel %vm343_vm5, %v1433_v51, %v338_v57  ;;  %v335_v62 = vsel %vm333_vm6, %v328_v58, %v1427_v54  ;;  %v336_v63 = vsel %vm333_vm6, %v1428_v53, %v328_v58 }
 0x10f   : > { %v1221_v3 = vpack.c.bf16 %v345_v60, %v335_v62  ;;  %v1237_v5 = vpack.c.bf16 %v346_v61, %v336_v63  ;;  %1220 = vmatprep.subr.bf16.mxu0 %v1219_v59 }
 0x111   : > { %v1441_v9 = vpop.permute.xlu1 %1440  ;;  %v1436_v10 = vpop.permute.xlu0 %1435  ;;  %1222 = vmatpush1.bf16.msra.mxu0 %v1221_v3  ;;  %1238 = vmatpush3.bf16.msra.mxu1 %v1237_v5 }
 0x112   : > { %v1443_v11 = vunpack.i.h.bf16 %v1441_v9  ;;  %v1442_v12 = vunpack.i.l.bf16 %v1441_v9  ;;  %v1438_v14 = vunpack.i.h.bf16 %v1436_v10  ;;  %v1437_v15 = vunpack.i.l.bf16 %v1436_v10  ;;  %1239 = vmatprep.subr.bf16.mxu1 %v1718_v0 }
 0x114   : > { %v354_v16 = vsel %vm353_vm8, %v1437_v15, %v1438_v14  ;;  %v364_v19 = vsel %vm363_vm7, %v1442_v12, %v1443_v11 }
 0x115   : > { %v358_v20 = vpop.permute.xlu1 %357  ;;  %v348_v21 = vpop.permute.xlu0 %347  ;;  %v1223_v22 = vpack.c.bf16 %v364_v19, %v354_v16 }
 0x116   : > { %v365_v23 = vsel %vm363_vm7, %v358_v20, %v1442_v12  ;;  %v366_v24 = vsel %vm363_vm7, %v1443_v11, %v358_v20  ;;  %v355_v25 = vsel %vm353_vm8, %v348_v21, %v1437_v15  ;;  %v356_v26 = vsel %vm353_vm8, %v1438_v14, %v348_v21 }
 0x117   : > { %v1225_v27 = vpack.c.bf16 %v365_v23, %v355_v25  ;;  %v1240_v28 = vpack.c.bf16 %v366_v24, %v356_v26  ;;  %1224 = vmatprep.subr.bf16.mxu0 %v1223_v22 }
 0x119   : > { %1226 = vmatpush1.bf16.msra.mxu0 %v1225_v27  ;;  %1241 = vmatpush3.bf16.msra.mxu1 %v1240_v28 }
 0x11a   : > { %1262 = vmatprep.subr.bf16.mxu1 %v1718_v0 }
 0x11c   : > { %1096 = vmatmul.mubr.msk.f32.vlgmr.msra.gmra.mrb[0].mxu0 %vm368_vm9, %v367_v29  ;;  %1159 = vmatmul.mubr.msk.f32.vlgmr.msra.gmra.mrb[0].mxu1 %vm368_vm9, %v367_v29 }
 0x11d   : > { %668 = vmatprep.mubr.f32.mxu0 %v1725_v6  ;;  %1181 = vmatprep.mubr.msk.f32.mxu1 %vm1726_vm0, %v1725_v6 }
 0x1ef   : > { %v438_v34 = vpop.f32.mrb[0].mxu0  ;;  %v509_v35 = vpop.f32.mrb[0].mxu1 }
 0x1f0   : > { %v2092_v36 = vmul.f32 %v2086_v32, %v509_v35  ;;  %v440_v37 = vpop.f32.mrb[1].mxu0  ;;  %v1160_v38 = vpop.f32.mrb[1].mxu1  ;;  %v2095_v39 = vmul.f32 %v2089_v33, %v438_v34 }
 0x1f1   : > { %v2105_v7 = vmul.f32 %v2098_v40, %v440_v37 }
 0x1f2   : > { %541 = vrot.lane.b32.xlu0 %v2092_v36, %s1719_s24  ;;  %532 = vrot.lane.b32.xlu1 %v2092_v36, %s1720_s26 }
 0x1f3   : > { %v1444_v41 = vpack.i.bf16 %v2105_v7, %v2095_v39  ;;  %v1469_v42 = vpack.i.bf16 %v2092_v36, %v2105_v7 }
 0x1f6   : > { %550 = vrot.lane.b32.xlu1 %v2092_v36, %s1721_s23  ;;  %564 = vrot.lane.b32.xlu0 %v2095_v39, %s1724_s30 }
 0x1fa   : > { %559 = vrot.lane.b32.xlu1 %v2092_v36, %s1722_s7  ;;  %1445 = vrot.lane.b32.xlu0 %v1444_v41, %s1720_s26 }
 0x1fe   : > { %1455 = vrot.lane.b32.xlu1 %v1444_v41, %s1721_s23  ;;  %1450 = vrot.lane.b32.xlu0 %v1444_v41, %s1719_s24 }
 0x202   : > { %573 = vrot.lane.b32.xlu1 %v2095_v39, %s1723_s10  ;;  %1460 = vrot.lane.b32.xlu0 %v1444_v41, %s1722_s7 }
 0x206   : > { %1470 = vrot.lane.b32.xlu1 %v1469_v42, %s1723_s10  ;;  %1465 = vrot.lane.b32.xlu0 %v1469_v42, %s1724_s30 }
 0x20a   : > { %1480 = vrot.lane.b32.xlu1 %v1469_v42, %s1727_s17  ;;  %1475 = vrot.lane.b32.xlu0 %v1469_v42, %s1728_s27 }
 0x20e   : > { %591 = vrot.lane.b32.xlu1 %v2095_v39, %s1727_s17  ;;  %582 = vrot.lane.b32.xlu0 %v2095_v39, %s1728_s27 }
 0x264   : > { %v542_v43 = vpop.permute.xlu0 %541  ;;  %v533_v44 = vpop.permute.xlu1 %532 }
 0x268   : > { %v551_v45 = vpop.permute.xlu1 %550  ;;  %v565_v46 = vpop.permute.xlu0 %564 }
 0x26c   : > { %v560_v47 = vpop.permute.xlu1 %559  ;;  %v1446_v48 = vpop.permute.xlu0 %1445 }
 0x26d   : > { %v1448_v49 = vunpack.i.h.bf16 %v1446_v48  ;;  %v1447_v50 = vunpack.i.l.bf16 %v1446_v48 }
 0x26f   : > { %v534_v51 = vsel %vm293_vm1, %v1448_v49, %v533_v44  ;;  %v536_v52 = vsel %vm293_vm1, %v533_v44, %v1447_v50  ;;  %v535_v53 = vsel %vm293_vm1, %v1447_v50, %v1448_v49 }
 0x270   : > { %v1263_v54 = vpack.c.bf16 %v534_v51, %v2013_v18  ;;  %v1244_v55 = vpack.c.bf16 %v536_v52, %v2011_v17  ;;  %v1456_v56 = vpop.permute.xlu1 %1455  ;;  %v1451_v57 = vpop.permute.xlu0 %1450  ;;  %v1242_v58 = vpack.c.bf16 %v535_v53, %v2007_v13 }
 0x271   : > { %v1458_v59 = vunpack.i.h.bf16 %v1456_v56  ;;  %v1457_v60 = vunpack.i.l.bf16 %v1456_v56  ;;  %v1453_v61 = vunpack.i.h.bf16 %v1451_v57  ;;  %v1452_v62 = vunpack.i.l.bf16 %v1451_v57 }
 0x272   : > { %1243 = vmatprep.subr.bf16.mxu0 %v1242_v58  ;;  %1264 = vmatpush3.bf16.msra.mxu1 %v1263_v54 }
 0x273   : > { %v552_v63 = vsel %vm313_vm2, %v1458_v59, %v551_v45  ;;  %v554_v3 = vsel %vm313_vm2, %v551_v45, %v1457_v60  ;;  %v543_v5 = vsel %vm303_vm3, %v1453_v61, %v542_v43  ;;  %v545_v9 = vsel %vm303_vm3, %v542_v43, %v1452_v62  ;;  %1245 = vmatpush1.bf16.msra.mxu0 %v1244_v55 }
 0x274   : > { %v1266_v10 = vpack.c.bf16 %v552_v63, %v543_v5  ;;  %v1248_v11 = vpack.c.bf16 %v554_v3, %v545_v9  ;;  %v574_v12 = vpop.permute.xlu1 %573  ;;  %v1461_v14 = vpop.permute.xlu0 %1460  ;;  %1265 = vmatprep.subr.bf16.mxu1 %v1718_v0  ;;  %v544_v15 = vsel %vm303_vm3, %v1452_v62, %v1453_v61  ;;  %v553_v16 = vsel %vm313_vm2, %v1457_v60, %v1458_v59  ;;  %v600_v62 = vld [vmem:[%s2351_s3] sm:$0xff] }
 0x275   : > { %v1463_v19 = vunpack.i.h.bf16 %v1461_v14  ;;  %v1462_v20 = vunpack.i.l.bf16 %v1461_v14  ;;  %v1246_v21 = vpack.c.bf16 %v553_v16, %v544_v15 }
 0x276   : > { %1267 = vmatpush3.bf16.msra.mxu1 %v1266_v10 }
 0x277   : > { %v561_v22 = vsel %vm323_vm4, %v1463_v19, %v560_v47  ;;  %v563_v23 = vsel %vm323_vm4, %v560_v47, %v1462_v20  ;;  %1247 = vmatprep.subr.bf16.mxu0 %v1246_v21  ;;  %1268 = vmatprep.subr.bf16.mxu1 %v1718_v0  ;;  %v562_v24 = vsel %vm323_vm4, %v1462_v20, %v1463_v19 }
 0x278   : > { %v1269_v25 = vpack.c.bf16 %v2092_v36, %v561_v22  ;;  %v1252_v26 = vpack.c.bf16 %v2095_v39, %v563_v23  ;;  %1249 = vmatpush1.bf16.msra.mxu0 %v1248_v11  ;;  %v1471_v27 = vpop.permute.xlu1 %1470  ;;  %v1466_v28 = vpop.permute.xlu0 %1465  ;;  %v1250_v29 = vpack.c.bf16 %v2105_v7, %v562_v24 }
 0x279   : > { %v1473_v30 = vunpack.i.h.bf16 %v1471_v27  ;;  %v1472_v31 = vunpack.i.l.bf16 %v1471_v27  ;;  %v1468_v34 = vunpack.i.h.bf16 %v1466_v28  ;;  %v1467_v35 = vunpack.i.l.bf16 %v1466_v28 }
 0x27a   : > { %1251 = vmatprep.subr.bf16.mxu0 %v1250_v29  ;;  %1270 = vmatpush3.bf16.msra.mxu1 %v1269_v25 }
 0x27b   : > { %v581_v37 = vsel %vm343_vm5, %v1473_v30, %v574_v12  ;;  %v580_v38 = vsel %vm343_vm5, %v574_v12, %v1472_v31  ;;  %v572_v36 = vsel %vm333_vm6, %v1468_v34, %v565_v46  ;;  %v571_v39 = vsel %vm333_vm6, %v565_v46, %v1467_v35  ;;  %1271 = vmatprep.subr.bf16.mxu1 %v1718_v0 }
 0x27c   : > { %v1272_v7 = vpack.c.bf16 %v581_v37, %v572_v36  ;;  %v1256_v41 = vpack.c.bf16 %v580_v38, %v571_v39  ;;  %1253 = vmatpush1.bf16.msra.mxu0 %v1252_v26  ;;  %v1481_v42 = vpop.permute.xlu1 %1480  ;;  %v1476_v43 = vpop.permute.xlu0 %1475  ;;  %v570_v44 = vsel %vm333_vm6, %v1467_v35, %v1468_v34  ;;  %v579_v45 = vsel %vm343_vm5, %v1472_v31, %v1473_v30 }
 0x27d   : > { %v1483_v47 = vunpack.i.h.bf16 %v1481_v42  ;;  %v1482_v48 = vunpack.i.l.bf16 %v1481_v42  ;;  %v1478_v49 = vunpack.i.h.bf16 %v1476_v43  ;;  %v1477_v50 = vunpack.i.l.bf16 %v1476_v43 }
 0x27e   : > { %v1254_v51 = vpack.c.bf16 %v579_v45, %v570_v44  ;;  %1273 = vmatpush3.bf16.msra.mxu1 %v1272_v7 }
 0x27f   : > { %v588_v46 = vsel %vm353_vm8, %v1477_v50, %v1478_v49  ;;  %v597_v52 = vsel %vm363_vm7, %v1482_v48, %v1483_v47  ;;  %1274 = vmatprep.subr.bf16.mxu1 %v1718_v0 }
 0x280   : > { %1255 = vmatprep.subr.bf16.mxu0 %v1254_v51  ;;  %v592_v53 = vpop.permute.xlu1 %591  ;;  %v583_v54 = vpop.permute.xlu0 %582  ;;  %v1258_v55 = vpack.c.bf16 %v597_v52, %v588_v46 }
 0x281   : > { %1257 = vmatpush1.bf16.msra.mxu0 %v1256_v41  ;;  %v598_v56 = vsel %vm363_vm7, %v592_v53, %v1482_v48  ;;  %v599_v57 = vsel %vm363_vm7, %v1483_v47, %v592_v53  ;;  %v589_v58 = vsel %vm353_vm8, %v583_v54, %v1477_v50  ;;  %v590_v59 = vsel %vm353_vm8, %v1478_v49, %v583_v54 }
 0x282   : > { %v1260_v60 = vpack.c.bf16 %v598_v56, %v589_v58  ;;  %v1275_v61 = vpack.c.bf16 %v599_v57, %v590_v59  ;;  %1259 = vmatprep.subr.bf16.mxu0 %v1258_v55 }
 0x284   : > { %1276 = vmatpush3.bf16.msra.mxu1 %v1275_v61 }
 0x285   : > { %1261 = vmatpush1.bf16.msra.mxu0 %v1260_v60  ;;  %1297 = vmatprep.subr.bf16.mxu1 %v1718_v0 }
 0x287   : > { %1182 = vmatmul.mubr.msk.f32.vlgmr.msra.gmra.mrb[2].mxu1 %vm368_vm9, %v600_v62 }
 0x288   : > { %1098 = vmatmul.mubr.msk.f32.vlgmr.msra.gmra.mrb[2].mxu0 %vm368_vm9, %v600_v62  ;;  %1204 = vmatprep.mubr.msk.f32.mxu1 %vm1726_vm0, %v1725_v6 }
 0x289   : > { %891 = vmatprep.mubr.f32.mxu0 %v1725_v6 }
 0x35a   : > { %v741_v63 = vpop.f32.mrb[2].mxu1 }
 0x35b   : > { %v670_v3 = vpop.f32.mrb[2].mxu0  ;;  %v747_v5 = vmul.f32 %v741_v63, %v2086_v32  ;;  %v1183_v9 = vpop.f32.mrb[3].mxu1 }
 0x35c   : > { %v745_v10 = vmul.f32 %v670_v3, %v2089_v33  ;;  %v672_v11 = vpop.f32.mrb[3].mxu0 }
 0x35d   : > { %v2201_v12 = vadd.f32 %v747_v5, %v1974_v4  ;;  %v746_v15 = vmul.f32 %v672_v11, %v2098_v40 }
 0x35e   : > { %v2204_v14 = vadd.f32 %v745_v10, %v1966_v1 }
 0x35f   : > { %764 = vrot.lane.b32.xlu0 %v2201_v12, %s1719_s24  ;;  %755 = vrot.lane.b32.xlu1 %v2201_v12, %s1720_s26  ;;  %v2212_v6 = vadd.f32 %v746_v15, %v1968_v2 }
 0x361   : > { %v1484_v1 = vpack.i.bf16 %v2212_v6, %v2204_v14  ;;  %v1509_v2 = vpack.i.bf16 %v2201_v12, %v2212_v6 }
 0x363   : > { %773 = vrot.lane.b32.xlu1 %v2201_v12, %s1721_s23  ;;  %787 = vrot.lane.b32.xlu0 %v2204_v14, %s1724_s30 }
 0x367   : > { %782 = vrot.lane.b32.xlu1 %v2201_v12, %s1722_s7  ;;  %1485 = vrot.lane.b32.xlu0 %v1484_v1, %s1720_s26  ;;  %s2306_s26 = scalar_lea.hbm %s2353_s5, %s1315_s6 }
 0x36b   : > { %1495 = vrot.lane.b32.xlu1 %v1484_v1, %s1721_s23  ;;  %1490 = vrot.lane.b32.xlu0 %v1484_v1, %s1719_s24  ;;  %s1638_s23 = scalar_lea.vmem %s2301_s9, 384 }
 0x36c   : > { %p1639_p1 = scmp.ne.s32.totalorder %s2301_s9, %s1638_s23 }
 0x36e   : > { %p1640_p4 = pnand %p1639_p1, %p1902_p6 }
 0x36f   : > { %796 = vrot.lane.b32.xlu1 %v2204_v14, %s1723_s10  ;;  %1500 = vrot.lane.b32.xlu0 %v1484_v1, %s1722_s7  ;;  %s1642_s7 = sshll.u32 %s1729_s22, 4  ;;  %s1643_s7 = int_to_ptr.vmem [resolvable:$false] %s1642_s7 }
 0x370   : > { %p1641_p8 = pneg %p1640_p4  ;;  %p1645_p3 = scmp.lt.s32.totalorder %s2301_s9, %s1643_s7 }
 0x373   : > { %1510 = vrot.lane.b32.xlu1 %v1509_v2, %s1723_s10  ;;  %1505 = vrot.lane.b32.xlu0 %v1509_v2, %s1724_s30  ;;  %s1644_s10 = scalar_lea.vmem %s1643_s7, 768 }
 0x374   : > { %p1646_p7 = scmp.lt.s32.totalorder %s1644_s10, %s1638_s23 }
 0x376   : > { %p1647_p10 = por %p1646_p7, %p1645_p3 }
 0x377   : > { %1520 = vrot.lane.b32.xlu1 %v1509_v2, %s1727_s17  ;;  %1515 = vrot.lane.b32.xlu0 %v1509_v2, %s1728_s27 }
 0x378   : > { %p1648_p13 = pnand %p1647_p10, %p1641_p8 }
 0x37b   : > { %814 = vrot.lane.b32.xlu1 %v2204_v14, %s1727_s17  ;;  %805 = vrot.lane.b32.xlu0 %v2204_v14, %s1728_s27 }
 0x3d1   : > { %v765_v4 = vpop.permute.xlu0 %764  ;;  %v756_v32 = vpop.permute.xlu1 %755 }
 0x3d5   : > { %v774_v33 = vpop.permute.xlu1 %773  ;;  %v788_v40 = vpop.permute.xlu0 %787 }
 0x3d9   : > { %v783_v16 = vpop.permute.xlu1 %782  ;;  %v1486_v19 = vpop.permute.xlu0 %1485 }
 0x3da   : > { %v1488_v20 = vunpack.i.h.bf16 %v1486_v19  ;;  %v1487_v21 = vunpack.i.l.bf16 %v1486_v19 }
 0x3dc   : > { %v757_v22 = vsel %vm293_vm1, %v1488_v20, %v756_v32  ;;  %v759_v23 = vsel %vm293_vm1, %v756_v32, %v1487_v21  ;;  %v758_v24 = vsel %vm293_vm1, %v1487_v21, %v1488_v20 }
 0x3dd   : > { %v1298_v25 = vpack.c.bf16 %v757_v22, %v2013_v18  ;;  %v1279_v26 = vpack.c.bf16 %v759_v23, %v2011_v17  ;;  %v1496_v27 = vpop.permute.xlu1 %1495  ;;  %v1491_v28 = vpop.permute.xlu0 %1490  ;;  %v1277_v29 = vpack.c.bf16 %v758_v24, %v2007_v13  ;;  %v823_v22 = vld [vmem:[#allocation8] sm:$0xff] }
 0x3de   : > { %v1498_v30 = vunpack.i.h.bf16 %v1496_v27  ;;  %v1497_v31 = vunpack.i.l.bf16 %v1496_v27  ;;  %v1493_v34 = vunpack.i.h.bf16 %v1491_v28  ;;  %v1492_v35 = vunpack.i.l.bf16 %v1491_v28 }
 0x3df   : > { %1278 = vmatprep.subr.bf16.mxu0 %v1277_v29  ;;  %1299 = vmatpush3.bf16.msra.mxu1 %v1298_v25 }
 0x3e0   : > { %v775_v37 = vsel %vm313_vm2, %v1498_v30, %v774_v33  ;;  %v777_v38 = vsel %vm313_vm2, %v774_v33, %v1497_v31  ;;  %v766_v18 = vsel %vm303_vm3, %v1493_v34, %v765_v4  ;;  %v768_v17 = vsel %vm303_vm3, %v765_v4, %v1492_v35  ;;  %1280 = vmatpush1.bf16.msra.mxu0 %v1279_v26 }
 0x3e1   : > { %v1301_v13 = vpack.c.bf16 %v775_v37, %v766_v18  ;;  %v1283_v36 = vpack.c.bf16 %v777_v38, %v768_v17  ;;  %v797_v39 = vpop.permute.xlu1 %796  ;;  %v1501_v7 = vpop.permute.xlu0 %1500  ;;  %1300 = vmatprep.subr.bf16.mxu1 %v1718_v0  ;;  %v767_v41 = vsel %vm303_vm3, %v1492_v35, %v1493_v34  ;;  %v776_v42 = vsel %vm313_vm2, %v1497_v31, %v1498_v30 }
 0x3e2   : > { %v1503_v43 = vunpack.i.h.bf16 %v1501_v7  ;;  %v1502_v44 = vunpack.i.l.bf16 %v1501_v7  ;;  %v1281_v45 = vpack.c.bf16 %v776_v42, %v767_v41 }
 0x3e3   : > { %1302 = vmatpush3.bf16.msra.mxu1 %v1301_v13 }
 0x3e4   : > { %v784_v47 = vsel %vm323_vm4, %v1503_v43, %v783_v16  ;;  %v786_v48 = vsel %vm323_vm4, %v783_v16, %v1502_v44  ;;  %1282 = vmatprep.subr.bf16.mxu0 %v1281_v45  ;;  %1303 = vmatprep.subr.bf16.mxu1 %v1718_v0  ;;  %v785_v49 = vsel %vm323_vm4, %v1502_v44, %v1503_v43 }
 0x3e5   : > { %v1304_v50 = vpack.c.bf16 %v2201_v12, %v784_v47  ;;  %v1287_v51 = vpack.c.bf16 %v2204_v14, %v786_v48  ;;  %1284 = vmatpush1.bf16.msra.mxu0 %v1283_v36  ;;  %v1511_v46 = vpop.permute.xlu1 %1510  ;;  %v1506_v52 = vpop.permute.xlu0 %1505  ;;  %v1285_v53 = vpack.c.bf16 %v2212_v6, %v785_v49 }
 0x3e6   : > { %v1513_v54 = vunpack.i.h.bf16 %v1511_v46  ;;  %v1512_v55 = vunpack.i.l.bf16 %v1511_v46  ;;  %v1508_v56 = vunpack.i.h.bf16 %v1506_v52  ;;  %v1507_v57 = vunpack.i.l.bf16 %v1506_v52 }
 0x3e7   : > { %1286 = vmatprep.subr.bf16.mxu0 %v1285_v53  ;;  %1305 = vmatpush3.bf16.msra.mxu1 %v1304_v50 }
 0x3e8   : > { %v804_v58 = vsel %vm343_vm5, %v1513_v54, %v797_v39  ;;  %v803_v59 = vsel %vm343_vm5, %v797_v39, %v1512_v55  ;;  %v795_v60 = vsel %vm333_vm6, %v1508_v56, %v788_v40  ;;  %v794_v61 = vsel %vm333_vm6, %v788_v40, %v1507_v57  ;;  %1306 = vmatprep.subr.bf16.mxu1 %v1718_v0 }
 0x3e9   : > { %v1307_v62 = vpack.c.bf16 %v804_v58, %v795_v60  ;;  %v1291_v63 = vpack.c.bf16 %v803_v59, %v794_v61  ;;  %1288 = vmatpush1.bf16.msra.mxu0 %v1287_v51  ;;  %v1521_v3 = vpop.permute.xlu1 %1520  ;;  %v1516_v5 = vpop.permute.xlu0 %1515  ;;  %v793_v9 = vsel %vm333_vm6, %v1507_v57, %v1508_v56  ;;  %v802_v10 = vsel %vm343_vm5, %v1512_v55, %v1513_v54 }
 0x3ea   : > { %v1523_v11 = vunpack.i.h.bf16 %v1521_v3  ;;  %v1522_v12 = vunpack.i.l.bf16 %v1521_v3  ;;  %v1518_v14 = vunpack.i.h.bf16 %v1516_v5  ;;  %v1517_v15 = vunpack.i.l.bf16 %v1516_v5 }
 0x3eb   : > { %v1289_v6 = vpack.c.bf16 %v802_v10, %v793_v9  ;;  %1308 = vmatpush3.bf16.msra.mxu1 %v1307_v62 }
 0x3ec   : > { %v811_v1 = vsel %vm353_vm8, %v1517_v15, %v1518_v14  ;;  %v820_v2 = vsel %vm363_vm7, %v1522_v12, %v1523_v11  ;;  %1309 = vmatprep.subr.bf16.mxu1 %v1718_v0 }
 0x3ed   : > { %1290 = vmatprep.subr.bf16.mxu0 %v1289_v6  ;;  %v815_v4 = vpop.permute.xlu1 %814  ;;  %v806_v32 = vpop.permute.xlu0 %805  ;;  %v1293_v33 = vpack.c.bf16 %v820_v2, %v811_v1 }
 0x3ee   : > { %1292 = vmatpush1.bf16.msra.mxu0 %v1291_v63  ;;  %v821_v40 = vsel %vm363_vm7, %v815_v4, %v1522_v12  ;;  %v822_v16 = vsel %vm363_vm7, %v1523_v11, %v815_v4  ;;  %v812_v19 = vsel %vm353_vm8, %v806_v32, %v1517_v15  ;;  %v813_v20 = vsel %vm353_vm8, %v1518_v14, %v806_v32 }
 0x3ef   : > { %v1295_v0 = vpack.c.bf16 %v821_v40, %v812_v19  ;;  %v1310_v21 = vpack.c.bf16 %v822_v16, %v813_v20  ;;  %1294 = vmatprep.subr.bf16.mxu0 %v1293_v33 }
 0x3f1   : > { %1311 = vmatpush3.bf16.msra.mxu1 %v1310_v21 }
 0x3f2   : > { %1296 = vmatpush1.bf16.msra.mxu0 %v1295_v0 }
 0x3f4   : > { %1205 = vmatmul.mubr.msk.f32.vlgmr.msra.gmra.mrb[4].mxu1 %vm368_vm9, %v823_v22 }
 0x3f5   : > { %1100 = vmatmul.mubr.msk.f32.vlgmr.msra.gmra.mrb[4].mxu0 %vm368_vm9, %v823_v22 }
 0x4c7   : > { %v964_v8 = vpop.f32.mrb[4].mxu1 }
 0x4c8   : > { %v893_v23 = vpop.f32.mrb[4].mxu0  ;;  %970 = vst [vmem:[%s278_s29 + $0x10] sm:$0xff] %v964_v8  ;;  %v1206_v24 = vpop.f32.mrb[5].mxu1 }
 0x4c9   : > { %968 = vst [vmem:[%s278_s29] sm:$0xff] %v893_v23  ;;  %v895_v25 = vpop.f32.mrb[5].mxu0 }
 0x4ca   : > { %969 = vst [vmem:[%s278_s29 + $0x8] sm:$0xff] %v895_v25 }
 0x4cb   : > { %1651 = shalt.err (!%p1648_p13)
}
 0x4cc   : > { %s1652_s11 = scalar_lea.hbm %s2306_s26, 384  ;;  %s1656_s27 = scalar_lea.hbm %s2353_s5, 768 }
 0x4cd   : > { %p1653_p5 = scmp.ne.s32.totalorder %s2306_s26, %s1652_s11  ;;  %p1657_p9 = scmp.lt.u32.totalorder %s2306_s26, %s2353_s5 }
 0x4ce   : > { %p1658_p12 = scmp.lt.u32.totalorder %s1656_s27, %s1652_s11  ;;  %p1660_p1 = scmp.lt.u32.totalorder %s1652_s11, %s2306_s26 }
 0x4cf   : > { %p1654_p0 = pnand %p1653_p5, %p1902_p6 }
 0x4d0   : > { %p1659_p2 = por %p1658_p12, %p1657_p9 }
 0x4d1   : > { %p1655_p11 = pneg %p1654_p0 }
 0x4d2   : > { %p1661_p4 = por %p1660_p1, %p1659_p2 }
 0x4d4   : > { %p1662_p8 = pnand %p1661_p4, %p1655_p11 }
 0x4d6   : > { %1665 = shalt.err (!%p1662_p8)
}
 0x4d7   : > { %1330 = dma.vmem_to_hbm [thread:$0]  (%p1902_p6), %s2301_s9, 384, %s2306_s26, %s972_s12  }
 0x4d8 PF: > { %s998_s29 = sand.u32 1, %s1700_s18   ;;  %p2371_p3 = scmp.ne.s32.totalorder %s2358_s25, 0 }
 0x4d9   : > { %p2372_p7 = scmp.ge.s32.totalorder %s1712_s21, 2  ;;  %s999_s6 = scalar_lea.sflag [#allocation4], %s998_s29 }
 0x4db   : > { %p1347_p10 = pnand %p2372_p7, %p2371_p3 }
 0x4dd   : > { %1695 = dma.done.wait (!%p1347_p10), %s999_s6, 384  }
 0x4de   : > { %1697 = vsyncadd (!%p1347_p10), %s999_s6, 4294966912  ;;  %p20_p13 = scmp.ge.s32.totalorder %s1888_s14, 4   ;;  %s2373_s18 = smov %s1704_s19 }
 0x4df   : > { %s2374_s19 = smov %s1708_s20  ;;  %s2375_s20 = smov %s1898_s28 }
 0x4e0   : > { %s2376_s21 = smov %s1888_s14  ;;  %22 = sbr.rel (!%p20_p13) target bundleno = 7 (0x7), region = 97 }
 0x4e7   :  { %1004 = vsyncpa [#allocation3], 1 }
 0x4e8   :  { %1006 = vsyncpa [#allocation3 + $0x1], 1 }
 0x4e9   :  { %1007 = vsyncpa [#allocation6], 1 }
 0x4ea   :  { %1008 = vsyncpa [#allocation9], 1 }
 0x4eb   :  { %1009 = vsyncpa [#allocation4], 1 }
 0x4ec   :  { %1011 = vsyncpa [#allocation4 + $0x1], 1 }

</bundles_post_ra>
